<compile_context>
chip_gen: v7x
topology: tpu7x:2x2x1
jax: 0.10.0
libtpu: 0.0.40
codegen_flags: <defaults>
</compile_context>

<pallas_src>
import functools
import math

import jax
import jax.numpy as jnp
from jax.experimental import pallas as pl
from jax.experimental.pallas import tpu as pltpu


# ------------------------------ fused kernel ----------------------------------
def _self_attn_kernel(tgt_ref, pos_ref, wq_ref, bq_ref, wk_ref, bk_ref,
                      wv_ref, bv_ref, wo_ref, bo_ref, g_ref, beta_ref,
                      mask_ref, red_ref, o_ref, *, nhead, eps):
    """One batch of SelfAttentionLayer (post-norm). tgt_ref/pos_ref/o_ref: (L, E)."""
    tgt = tgt_ref[...]                              # (L, E) f32   value tensor
    x = tgt + pos_ref[...]                          # q = k = tgt + query_pos
    xb = x.astype(jnp.bfloat16)
    tb = tgt.astype(jnp.bfloat16)

    # Projections (bf16 MXU, f32 accumulate). 1/sqrt(hd) already folded into wq/bq.
    q = jnp.dot(xb, wq_ref[...], preferred_element_type=jnp.float32) + bq_ref[...]
    k = jnp.dot(xb, wk_ref[...], preferred_element_type=jnp.float32) + bk_ref[...]
    v = jnp.dot(tb, wv_ref[...], preferred_element_type=jnp.float32) + bv_ref[...]

    # Head packing: mask[r, e] = (r // L == e // hd) selects head (r // L)'s lanes.
    # K/V tiled H times along sublanes then masked -> block-diagonal (H*L, E)
    # operands, so a single matmul covers all heads lane-densely.
    mask = mask_ref[...]                                                   # (H*L, E) bf16
    km = jnp.concatenate([k] * nhead, axis=0).astype(jnp.bfloat16) * mask  # (H*L, E)
    vm = jnp.concatenate([v] * nhead, axis=0).astype(jnp.bfloat16) * mask  # (H*L, E)

    # Scores for all heads: s[:, h*L:(h+1)*L] = q_h @ k_h^T  (scale pre-folded).
    s = jax.lax.dot_general(q.astype(jnp.bfloat16), km,
                            (((1,), (1,)), ((), ())),
                            preferred_element_type=jnp.float32)            # (L, H*L)

    # Softmax over each length-L column block. A per-row *global* max is a valid
    # stabilizer for every block (it is a constant shift within each row).
    m = jnp.max(s, axis=-1, keepdims=True)
    e = jnp.exp(s - m)                                                     # (L, H*L) f32
    red = red_ref[...]                                                     # (H*L, H) f32
    denom = jnp.dot(e, red, preferred_element_type=jnp.float32)            # (L, H) block sums
    recip = pl.reciprocal(denom, approx=True)                              # (L, H)
    recip_b = jax.lax.dot_general(recip, red, (((1,), (1,)), ((), ())),
                                  preferred_element_type=jnp.float32)      # (L, H*L)
    p = (e * recip_b).astype(jnp.bfloat16)

    # P @ V_blockdiag -> (L, E) with each head's output already in its lane block
    # (== torch's concat-heads layout); no per-head scratch stores needed.
    attn = jnp.dot(p, vm, preferred_element_type=jnp.float32)
    y = jnp.dot(attn.astype(jnp.bfloat16), wo_ref[...],
                preferred_element_type=jnp.float32) + bo_ref[...]

    # Residual + LayerNorm (PyTorch: biased variance, eps=1e-5). dropout(p=0)==id.
    res = tgt + y
    mu = jnp.mean(res, axis=-1, keepdims=True)
    var = jnp.mean(jnp.square(res - mu), axis=-1, keepdims=True)
    o_ref[...] = (res - mu) * jax.lax.rsqrt(var + eps) * g_ref[...] + beta_ref[...]


# ---------------------- one-time parameter folding (host) ----------------------
def fold_params(params, *, nhead, seq_len):
    """PyTorch-layout -> MXU-layout folding, done ONCE outside the jitted path."""
    E = params["ln_weight"].shape[0]
    assert E % nhead == 0
    hd = E // nhead
    L = seq_len
    scale = 1.0 / math.sqrt(hd)

    w_in = params["in_proj_weight"]                  # (3E, E) torch layout
    b_in = params["in_proj_bias"]                    # (3E,)
    folded = {
        "wq": (w_in[:E].T * scale).astype(jnp.bfloat16),          # scale folded into Q
        "bq": (b_in[:E] * scale).reshape(1, E).astype(jnp.float32),
        "wk": w_in[E:2 * E].T.astype(jnp.bfloat16),
        "bk": b_in[E:2 * E].reshape(1, E).astype(jnp.float32),
        "wv": w_in[2 * E:].T.astype(jnp.bfloat16),
        "bv": b_in[2 * E:].reshape(1, E).astype(jnp.float32),
        "wo": params["out_proj_weight"].T.astype(jnp.bfloat16),
        "bo": params["out_proj_bias"].reshape(1, E).astype(jnp.float32),
        "gamma": params["ln_weight"].reshape(1, E).astype(jnp.float32),
        "beta": params["ln_bias"].reshape(1, E).astype(jnp.float32),
    }
    # Head-packing constants: block-diagonal head-lane mask + per-head block-sum matrix.
    row_head = jnp.arange(nhead * L)[:, None] // L                            # (H*L, 1)
    folded["mask"] = (row_head == (jnp.arange(E)[None, :] // hd)).astype(jnp.bfloat16)
    folded["red"] = (row_head == jnp.arange(nhead)[None, :]).astype(jnp.float32)
    return folded


# --------------------------------- wrapper -------------------------------------
def self_attention_layer_forward(tgt, query_pos, folded, *, nhead):
    """SelfAttentionLayer.forward_post.  tgt/query_pos: (seq, batch, d_model)."""
    # TODO(synk): tgt_mask / tgt_key_padding_mask (the decoder passes None) and
    # the pre-norm (normalize_before=True) branch are not implemented.
    L, B, E = tgt.shape
    H = nhead
    assert folded["mask"].shape == (H * L, E)

    pos = query_pos if query_pos is not None else jnp.zeros_like(tgt)
    tgt3 = tgt.transpose(1, 0, 2)                    # (B, L, E) batch-major
    pos3 = pos.transpose(1, 0, 2)

    kernel = functools.partial(_self_attn_kernel, nhead=H, eps=1e-5)
    batch_blk = pl.BlockSpec((None, L, E), lambda b: (b, 0, 0))
    const2d = lambda shape: pl.BlockSpec(shape, lambda b: (0, 0))

    out3 = pl.pallas_call(
        kernel,
        grid=(B,),
        in_specs=[
            batch_blk,                               # tgt    (per-batch (L, E) block)
            batch_blk,                               # query_pos
            const2d((E, E)),                         # wq (bf16, scale folded)
            const2d((1, E)),                         # bq
            const2d((E, E)),                         # wk
            const2d((1, E)),                         # bk
            const2d((E, E)),                         # wv
            const2d((1, E)),                         # bv
            const2d((E, E)),                         # wo
            const2d((1, E)),                         # bo
            const2d((1, E)),                         # ln gamma
            const2d((1, E)),                         # ln beta
            const2d((H * L, E)),                     # head mask (block-diag selector)
            const2d((H * L, H)),                     # per-head block-sum matrix
        ],
        out_specs=batch_blk,
        out_shape=jax.ShapeDtypeStruct((B, L, E), jnp.float32),
        compiler_params=pltpu.CompilerParams(
            dimension_semantics=("parallel",)),
    )(tgt3, pos3, folded["wq"], folded["bq"], folded["wk"], folded["bk"],
      folded["wv"], folded["bv"], folded["wo"], folded["bo"],
      folded["gamma"], folded["beta"], folded["mask"], folded["red"])

    return out3.transpose(1, 0, 2)                   # back to (seq, batch, dim)


# ------------------------- pure-JAX reference (checks) -------------------------
def reference_forward(tgt, query_pos, params, nhead):
    L, B, E = tgt.shape
    hd = E // nhead
    w_in, b_in = params["in_proj_weight"], params["in_proj_bias"]
    x = tgt + query_pos
    q = jnp.einsum('lbe,fe->lbf', x, w_in[:E]) + b_in[:E]
    k = jnp.einsum('lbe,fe->lbf', x, w_in[E:2 * E]) + b_in[E:2 * E]
    v = jnp.einsum('lbe,fe->lbf', tgt, w_in[2 * E:]) + b_in[2 * E:]
    q = q.reshape(L, B * nhead, hd).transpose(1, 0, 2) * (hd ** -0.5)
    k = k.reshape(L, B * nhead, hd).transpose(1, 0, 2)
    v = v.reshape(L, B * nhead, hd).transpose(1, 0, 2)
    s = jnp.einsum('nld,nmd->nlm', q, k)
    p = jax.nn.softmax(s, axis=-1)
    o = jnp.einsum('nlm,nmd->nld', p, v)
    o = o.transpose(1, 0, 2).reshape(L, B, E)
    o = jnp.einsum('lbe,fe->lbf', o, params["out_proj_weight"]) + params["out_proj_bias"]
    y = tgt + o
    mu = jnp.mean(y, axis=-1, keepdims=True)
    var = jnp.mean(jnp.square(y - mu), axis=-1, keepdims=True)
    return (y - mu) / jnp.sqrt(var + 1e-5) * params["ln_weight"] + params["ln_bias"]


# ------------------------------ parameter init ---------------------------------
def init_params(key, d_model):
    k1, k2 = jax.random.split(key)
    E = d_model

    def xavier(k, shape):
        fan_in, fan_out = shape[1], shape[0]
        bound = math.sqrt(6.0 / (fan_in + fan_out))
        return jax.random.uniform(k, shape, jnp.float32, -bound, bound)

    return {
        "in_proj_weight": xavier(k1, (3 * E, E)),
        "in_proj_bias": jnp.zeros((3 * E,), jnp.float32),
        "out_proj_weight": xavier(k2, (E, E)),
        "out_proj_bias": jnp.zeros((E,), jnp.float32),
        "ln_weight": jnp.ones((E,), jnp.float32),
        "ln_bias": jnp.zeros((E,), jnp.float32),
    }


# ------------------------------------ main --------------------------------------
if __name__ == "__main__":
    L, B, E, H = 8, 2, 32, 4        # seq (num_queries), batch, d_model, nhead
    key = jax.random.PRNGKey(0)
    k_tgt, k_pos, k_par = jax.random.split(key, 3)
    tgt = jax.random.normal(k_tgt, (L, B, E), jnp.float32)
    query_pos = jax.random.normal(k_pos, (L, B, E), jnp.float32)
    params = init_params(k_par, E)

    folded = fold_params(params, nhead=H, seq_len=L)   # one-time, outside jit

    fwd = jax.jit(functools.partial(self_attention_layer_forward, nhead=H))
    out = jax.block_until_ready(fwd(tgt, query_pos, folded))

    assert out.shape == (L, B, E)
    assert bool(jnp.isfinite(out).all())

    ref = reference_forward(tgt, query_pos, params, H)
    max_err = float(jnp.max(jnp.abs(out - ref)))
    # bf16 MXU operands (per the perf review) => looser tolerance than pure-f32.
    assert max_err < 1e-1, f"mismatch vs reference, max abs err {max_err}"

    print("KERNEL_OK")
</pallas_src>

<mosaic_0001>
module attributes {stable_mosaic.version = 11 : i64} {
  func.func @_self_attn_kernel(%arg0: i32, %arg1: memref<1x8x32xf32, #tpu.memory_space<vmem>>, %arg2: memref<1x8x32xf32, #tpu.memory_space<vmem>>, %arg3: memref<32x32xbf16, #tpu.memory_space<vmem>>, %arg4: memref<1x32xf32, #tpu.memory_space<vmem>>, %arg5: memref<32x32xbf16, #tpu.memory_space<vmem>>, %arg6: memref<1x32xf32, #tpu.memory_space<vmem>>, %arg7: memref<32x32xbf16, #tpu.memory_space<vmem>>, %arg8: memref<1x32xf32, #tpu.memory_space<vmem>>, %arg9: memref<32x32xbf16, #tpu.memory_space<vmem>>, %arg10: memref<1x32xf32, #tpu.memory_space<vmem>>, %arg11: memref<1x32xf32, #tpu.memory_space<vmem>>, %arg12: memref<1x32xf32, #tpu.memory_space<vmem>>, %arg13: memref<32x32xbf16, #tpu.memory_space<vmem>>, %arg14: memref<32x4xf32, #tpu.memory_space<vmem>>, %arg15: memref<1x8x32xf32, #tpu.memory_space<vmem>>) attributes {dimension_semantics = [#tpu.dimension_semantics<parallel>], iteration_bounds = array<i64: 2>, scalar_prefetch = 0 : i64, scratch_operands = 0 : i64, tpu.core_type = #tpu.core_type<tc>, window_params = [{transform_indices = @transform_0, window_bounds = array<i64: 1, 8, 32>}, {transform_indices = @transform_1, window_bounds = array<i64: 1, 8, 32>}, {pipeline_mode = #tpu.pipeline_mode<synchronous>, transform_indices = @transform_2, window_bounds = array<i64: 32, 32>}, {pipeline_mode = #tpu.pipeline_mode<synchronous>, transform_indices = @transform_3, window_bounds = array<i64: 1, 32>}, {pipeline_mode = #tpu.pipeline_mode<synchronous>, transform_indices = @transform_4, window_bounds = array<i64: 32, 32>}, {pipeline_mode = #tpu.pipeline_mode<synchronous>, transform_indices = @transform_5, window_bounds = array<i64: 1, 32>}, {pipeline_mode = #tpu.pipeline_mode<synchronous>, transform_indices = @transform_6, window_bounds = array<i64: 32, 32>}, {pipeline_mode = #tpu.pipeline_mode<synchronous>, transform_indices = @transform_7, window_bounds = array<i64: 1, 32>}, {pipeline_mode = #tpu.pipeline_mode<synchronous>, transform_indices = @transform_8, window_bounds = array<i64: 32, 32>}, {pipeline_mode = #tpu.pipeline_mode<synchronous>, transform_indices = @transform_9, window_bounds = array<i64: 1, 32>}, {pipeline_mode = #tpu.pipeline_mode<synchronous>, transform_indices = @transform_10, window_bounds = array<i64: 1, 32>}, {pipeline_mode = #tpu.pipeline_mode<synchronous>, transform_indices = @transform_11, window_bounds = array<i64: 1, 32>}, {pipeline_mode = #tpu.pipeline_mode<synchronous>, transform_indices = @transform_12, window_bounds = array<i64: 32, 32>}, {pipeline_mode = #tpu.pipeline_mode<synchronous>, transform_indices = @transform_13, window_bounds = array<i64: 32, 4>}, {transform_indices = @transform_14, window_bounds = array<i64: 1, 8, 32>}]} {
    %c0 = arith.constant 0 : index
    %c0_0 = arith.constant 0 : index
    %c0_1 = arith.constant 0 : index
    %0 = vector.load %arg1[%c0, %c0_0, %c0_1] : memref<1x8x32xf32, #tpu.memory_space<vmem>>, vector<1x8x32xf32>
    %1 = vector.shape_cast %0 : vector<1x8x32xf32> to vector<8x32xf32>
    %c0_2 = arith.constant 0 : index
    %c0_3 = arith.constant 0 : index
    %c0_4 = arith.constant 0 : index
    %2 = vector.load %arg2[%c0_2, %c0_3, %c0_4] : memref<1x8x32xf32, #tpu.memory_space<vmem>>, vector<1x8x32xf32>
    %3 = vector.shape_cast %2 : vector<1x8x32xf32> to vector<8x32xf32>
    %4 = arith.addf %1, %3 : vector<8x32xf32>
    %5 = arith.truncf %4 : vector<8x32xf32> to vector<8x32xbf16>
    %6 = arith.truncf %1 : vector<8x32xf32> to vector<8x32xbf16>
    %c0_5 = arith.constant 0 : index
    %c0_6 = arith.constant 0 : index
    %7 = vector.load %arg3[%c0_5, %c0_6] : memref<32x32xbf16, #tpu.memory_space<vmem>>, vector<32x32xbf16>
    %cst = arith.constant dense<0.000000e+00> : vector<8x32xf32>
    %8 = tpu.matmul %5, %7, %cst {dimension_numbers = #tpu.dot_dimension_numbers<[1], [0], [0], [1], [0, 0, 1, 1], [], []>} : vector<8x32xbf16>, vector<32x32xbf16>, vector<8x32xf32> -> vector<8x32xf32>
    %c0_7 = arith.constant 0 : index
    %c0_8 = arith.constant 0 : index
    %9 = vector.load %arg4[%c0_7, %c0_8] : memref<1x32xf32, #tpu.memory_space<vmem>>, vector<1x32xf32>
    %10 = vector.broadcast %9 : vector<1x32xf32> to vector<8x32xf32>
    %11 = arith.addf %8, %10 : vector<8x32xf32>
    %c0_9 = arith.constant 0 : index
    %c0_10 = arith.constant 0 : index
    %12 = vector.load %arg5[%c0_9, %c0_10] : memref<32x32xbf16, #tpu.memory_space<vmem>>, vector<32x32xbf16>
    %cst_11 = arith.constant dense<0.000000e+00> : vector<8x32xf32>
    %13 = tpu.matmul %5, %12, %cst_11 {dimension_numbers = #tpu.dot_dimension_numbers<[1], [0], [0], [1], [0, 0, 1, 1], [], []>} : vector<8x32xbf16>, vector<32x32xbf16>, vector<8x32xf32> -> vector<8x32xf32>
    %c0_12 = arith.constant 0 : index
    %c0_13 = arith.constant 0 : index
    %14 = vector.load %arg6[%c0_12, %c0_13] : memref<1x32xf32, #tpu.memory_space<vmem>>, vector<1x32xf32>
    %15 = vector.broadcast %14 : vector<1x32xf32> to vector<8x32xf32>
    %16 = arith.addf %13, %15 : vector<8x32xf32>
    %c0_14 = arith.constant 0 : index
    %c0_15 = arith.constant 0 : index
    %17 = vector.load %arg7[%c0_14, %c0_15] : memref<32x32xbf16, #tpu.memory_space<vmem>>, vector<32x32xbf16>
    %cst_16 = arith.constant dense<0.000000e+00> : vector<8x32xf32>
    %18 = tpu.matmul %6, %17, %cst_16 {dimension_numbers = #tpu.dot_dimension_numbers<[1], [0], [0], [1], [0, 0, 1, 1], [], []>} : vector<8x32xbf16>, vector<32x32xbf16>, vector<8x32xf32> -> vector<8x32xf32>
    %c0_17 = arith.constant 0 : index
    %c0_18 = arith.constant 0 : index
    %19 = vector.load %arg8[%c0_17, %c0_18] : memref<1x32xf32, #tpu.memory_space<vmem>>, vector<1x32xf32>
    %20 = vector.broadcast %19 : vector<1x32xf32> to vector<8x32xf32>
    %21 = arith.addf %18, %20 : vector<8x32xf32>
    %c0_19 = arith.constant 0 : index
    %c0_20 = arith.constant 0 : index
    %22 = vector.load %arg13[%c0_19, %c0_20] : memref<32x32xbf16, #tpu.memory_space<vmem>>, vector<32x32xbf16>
    %23 = tpu.concatenate %16, %16, %16, %16 in 0 : vector<8x32xf32>, vector<8x32xf32>, vector<8x32xf32>, vector<8x32xf32> -> vector<32x32xf32>
    %24 = arith.truncf %23 : vector<32x32xf32> to vector<32x32xbf16>
    %25 = arith.mulf %24, %22 : vector<32x32xbf16>
    %26 = tpu.concatenate %21, %21, %21, %21 in 0 : vector<8x32xf32>, vector<8x32xf32>, vector<8x32xf32>, vector<8x32xf32> -> vector<32x32xf32>
    %27 = arith.truncf %26 : vector<32x32xf32> to vector<32x32xbf16>
    %28 = arith.mulf %27, %22 : vector<32x32xbf16>
    %29 = arith.truncf %11 : vector<8x32xf32> to vector<8x32xbf16>
    %cst_21 = arith.constant dense<0.000000e+00> : vector<8x32xf32>
    %30 = tpu.matmul %29, %25, %cst_21 {dimension_numbers = #tpu.dot_dimension_numbers<[1], [1], [0], [0], [0, 0, 1, 0], [], []>} : vector<8x32xbf16>, vector<32x32xbf16>, vector<8x32xf32> -> vector<8x32xf32>
    %cst_22 = arith.constant dense<0xFF800000> : vector<8xf32>
    %31 = vector.multi_reduction <maximumf>, %30, %cst_22 [1] : vector<8x32xf32> to vector<8xf32>
    %32 = vector.shape_cast %31 : vector<8xf32> to vector<8x1xf32>
    %33 = vector.broadcast %32 : vector<8x1xf32> to vector<8x32xf32>
    %34 = arith.subf %30, %33 : vector<8x32xf32>
    %35 = math.exp %34 : vector<8x32xf32>
    %c0_23 = arith.constant 0 : index
    %c0_24 = arith.constant 0 : index
    %36 = vector.load %arg14[%c0_23, %c0_24] : memref<32x4xf32, #tpu.memory_space<vmem>>, vector<32x4xf32>
    %cst_25 = arith.constant dense<0.000000e+00> : vector<8x4xf32>
    %37 = tpu.matmul %35, %36, %cst_25 {dimension_numbers = #tpu.dot_dimension_numbers<[1], [0], [0], [1], [0, 0, 1, 1], [], []>} : vector<8x32xf32>, vector<32x4xf32>, vector<8x4xf32> -> vector<8x4xf32>
    %38 = tpu.reciprocal %37 {approx = true} : vector<8x4xf32> -> vector<8x4xf32>
    %cst_26 = arith.constant dense<0.000000e+00> : vector<8x32xf32>
    %39 = tpu.matmul %38, %36, %cst_26 {dimension_numbers = #tpu.dot_dimension_numbers<[1], [1], [0], [0], [0, 0, 1, 0], [], []>} : vector<8x4xf32>, vector<32x4xf32>, vector<8x32xf32> -> vector<8x32xf32>
    %40 = arith.mulf %35, %39 : vector<8x32xf32>
    %41 = arith.truncf %40 : vector<8x32xf32> to vector<8x32xbf16>
    %cst_27 = arith.constant dense<0.000000e+00> : vector<8x32xf32>
    %42 = tpu.matmul %41, %28, %cst_27 {dimension_numbers = #tpu.dot_dimension_numbers<[1], [0], [0], [1], [0, 0, 1, 1], [], []>} : vector<8x32xbf16>, vector<32x32xbf16>, vector<8x32xf32> -> vector<8x32xf32>
    %43 = arith.truncf %42 : vector<8x32xf32> to vector<8x32xbf16>
    %c0_28 = arith.constant 0 : index
    %c0_29 = arith.constant 0 : index
    %44 = vector.load %arg9[%c0_28, %c0_29] : memref<32x32xbf16, #tpu.memory_space<vmem>>, vector<32x32xbf16>
    %cst_30 = arith.constant dense<0.000000e+00> : vector<8x32xf32>
    %45 = tpu.matmul %43, %44, %cst_30 {dimension_numbers = #tpu.dot_dimension_numbers<[1], [0], [0], [1], [0, 0, 1, 1], [], []>} : vector<8x32xbf16>, vector<32x32xbf16>, vector<8x32xf32> -> vector<8x32xf32>
    %c0_31 = arith.constant 0 : index
    %c0_32 = arith.constant 0 : index
    %46 = vector.load %arg10[%c0_31, %c0_32] : memref<1x32xf32, #tpu.memory_space<vmem>>, vector<1x32xf32>
    %47 = vector.broadcast %46 : vector<1x32xf32> to vector<8x32xf32>
    %48 = arith.addf %45, %47 : vector<8x32xf32>
    %49 = arith.addf %1, %48 : vector<8x32xf32>
    %cst_33 = arith.constant dense<0.000000e+00> : vector<8xf32>
    %50 = vector.multi_reduction <add>, %49, %cst_33 [1] : vector<8x32xf32> to vector<8xf32>
    %51 = vector.shape_cast %50 : vector<8xf32> to vector<8x1xf32>
    %cst_34 = arith.constant 3.200000e+01 : f32
    %52 = vector.broadcast %cst_34 : f32 to vector<8x1xf32>
    %53 = arith.divf %51, %52 : vector<8x1xf32>
    %54 = vector.broadcast %53 : vector<8x1xf32> to vector<8x32xf32>
    %55 = arith.subf %49, %54 : vector<8x32xf32>
    %56 = arith.mulf %55, %55 : vector<8x32xf32>
    %cst_35 = arith.constant dense<0.000000e+00> : vector<8xf32>
    %57 = vector.multi_reduction <add>, %56, %cst_35 [1] : vector<8x32xf32> to vector<8xf32>
    %58 = vector.shape_cast %57 : vector<8xf32> to vector<8x1xf32>
    %cst_36 = arith.constant 3.200000e+01 : f32
    %59 = vector.broadcast %cst_36 : f32 to vector<8x1xf32>
    %60 = arith.divf %58, %59 : vector<8x1xf32>
    %61 = vector.broadcast %53 : vector<8x1xf32> to vector<8x32xf32>
    %62 = arith.subf %49, %61 : vector<8x32xf32>
    %cst_37 = arith.constant 9.99999974E-6 : f32
    %63 = vector.broadcast %cst_37 : f32 to vector<8x1xf32>
    %64 = arith.addf %60, %63 : vector<8x1xf32>
    %65 = math.rsqrt %64 : vector<8x1xf32>
    %66 = vector.broadcast %65 : vector<8x1xf32> to vector<8x32xf32>
    %67 = arith.mulf %62, %66 : vector<8x32xf32>
    %c0_38 = arith.constant 0 : index
    %c0_39 = arith.constant 0 : index
    %68 = vector.load %arg11[%c0_38, %c0_39] : memref<1x32xf32, #tpu.memory_space<vmem>>, vector<1x32xf32>
    %69 = vector.broadcast %68 : vector<1x32xf32> to vector<8x32xf32>
    %70 = arith.mulf %67, %69 : vector<8x32xf32>
    %c0_40 = arith.constant 0 : index
    %c0_41 = arith.constant 0 : index
    %71 = vector.load %arg12[%c0_40, %c0_41] : memref<1x32xf32, #tpu.memory_space<vmem>>, vector<1x32xf32>
    %72 = vector.broadcast %71 : vector<1x32xf32> to vector<8x32xf32>
    %73 = arith.addf %70, %72 : vector<8x32xf32>
    %c0_42 = arith.constant 0 : index
    %c0_43 = arith.constant 0 : index
    %c0_44 = arith.constant 0 : index
    %74 = vector.load %arg15[%c0_42, %c0_43, %c0_44] : memref<1x8x32xf32, #tpu.memory_space<vmem>>, vector<1x8x32xf32>
    %75 = vector.shape_cast %74 : vector<1x8x32xf32> to vector<8x32xf32>
    %76 = vector.shape_cast %73 : vector<8x32xf32> to vector<1x8x32xf32>
    tpu.vector_store %arg15[%c0_42, %c0_43, %c0_44], %76 {strides = array<i32>} : memref<1x8x32xf32, #tpu.memory_space<vmem>>, vector<1x8x32xf32>,
    return
  }
  func.func @transform_0(%arg0: i32) -> (i32, i32, i32) {
    %c0_i32 = arith.constant 0 : i32
    %c0_i32_0 = arith.constant 0 : i32
    %c0_i32_1 = arith.constant 0 : i32
    return %arg0, %c0_i32, %c0_i32_0 : i32, i32, i32
  }
  func.func @transform_1(%arg0: i32) -> (i32, i32, i32) {
    %c0_i32 = arith.constant 0 : i32
    %c0_i32_0 = arith.constant 0 : i32
    %c0_i32_1 = arith.constant 0 : i32
    return %arg0, %c0_i32, %c0_i32_0 : i32, i32, i32
  }
  func.func @transform_2(%arg0: i32) -> (i32, i32) {
    %c0_i32 = arith.constant 0 : i32
    %c0_i32_0 = arith.constant 0 : i32
    %c0_i32_1 = arith.constant 0 : i32
    return %c0_i32, %c0_i32_0 : i32, i32
  }
  func.func @transform_3(%arg0: i32) -> (i32, i32) {
    %c0_i32 = arith.constant 0 : i32
    %c0_i32_0 = arith.constant 0 : i32
    %c0_i32_1 = arith.constant 0 : i32
    return %c0_i32, %c0_i32_0 : i32, i32
  }
  func.func @transform_4(%arg0: i32) -> (i32, i32) {
    %c0_i32 = arith.constant 0 : i32
    %c0_i32_0 = arith.constant 0 : i32
    %c0_i32_1 = arith.constant 0 : i32
    return %c0_i32, %c0_i32_0 : i32, i32
  }
  func.func @transform_5(%arg0: i32) -> (i32, i32) {
    %c0_i32 = arith.constant 0 : i32
    %c0_i32_0 = arith.constant 0 : i32
    %c0_i32_1 = arith.constant 0 : i32
    return %c0_i32, %c0_i32_0 : i32, i32
  }
  func.func @transform_6(%arg0: i32) -> (i32, i32) {
    %c0_i32 = arith.constant 0 : i32
    %c0_i32_0 = arith.constant 0 : i32
    %c0_i32_1 = arith.constant 0 : i32
    return %c0_i32, %c0_i32_0 : i32, i32
  }
  func.func @transform_7(%arg0: i32) -> (i32, i32) {
    %c0_i32 = arith.constant 0 : i32
    %c0_i32_0 = arith.constant 0 : i32
    %c0_i32_1 = arith.constant 0 : i32
    return %c0_i32, %c0_i32_0 : i32, i32
  }
  func.func @transform_8(%arg0: i32) -> (i32, i32) {
    %c0_i32 = arith.constant 0 : i32
    %c0_i32_0 = arith.constant 0 : i32
    %c0_i32_1 = arith.constant 0 : i32
    return %c0_i32, %c0_i32_0 : i32, i32
  }
  func.func @transform_9(%arg0: i32) -> (i32, i32) {
    %c0_i32 = arith.constant 0 : i32
    %c0_i32_0 = arith.constant 0 : i32
    %c0_i32_1 = arith.constant 0 : i32
    return %c0_i32, %c0_i32_0 : i32, i32
  }
  func.func @transform_10(%arg0: i32) -> (i32, i32) {
    %c0_i32 = arith.constant 0 : i32
    %c0_i32_0 = arith.constant 0 : i32
    %c0_i32_1 = arith.constant 0 : i32
    return %c0_i32, %c0_i32_0 : i32, i32
  }
  func.func @transform_11(%arg0: i32) -> (i32, i32) {
    %c0_i32 = arith.constant 0 : i32
    %c0_i32_0 = arith.constant 0 : i32
    %c0_i32_1 = arith.constant 0 : i32
    return %c0_i32, %c0_i32_0 : i32, i32
  }
  func.func @transform_12(%arg0: i32) -> (i32, i32) {
    %c0_i32 = arith.constant 0 : i32
    %c0_i32_0 = arith.constant 0 : i32
    %c0_i32_1 = arith.constant 0 : i32
    return %c0_i32, %c0_i32_0 : i32, i32
  }
  func.func @transform_13(%arg0: i32) -> (i32, i32) {
    %c0_i32 = arith.constant 0 : i32
    %c0_i32_0 = arith.constant 0 : i32
    %c0_i32_1 = arith.constant 0 : i32
    return %c0_i32, %c0_i32_0 : i32, i32
  }
  func.func @transform_14(%arg0: i32) -> (i32, i32, i32) {
    %c0_i32 = arith.constant 0 : i32
    %c0_i32_0 = arith.constant 0 : i32
    %c0_i32_1 = arith.constant 0 : i32
    return %arg0, %c0_i32, %c0_i32_0 : i32, i32, i32
  }
}

</mosaic_0001>

<bundles_post_ra>
// kernel: self_attention_layer_forward.1
= control target key start
LH: loop header
LB: loop body
LE: loop exit
PB: predicated region body
PF: predicated region fallthrough
CT: control target
= control target key end

     0   :  { %s1396_s29 = smov 0   ;;  %s1535_s0 = inlined_call_operand.vmem [shape: f32[2,8,32], index: 0, kind: input, shape index: {}]   ;;  %s1536_s1 = inlined_call_operand.vmem [shape: f32[2,8,32], index: 1, kind: input, shape index: {}]   ;;  %s1537_s2 = inlined_call_operand.vmem [shape: bf16[32,32], index: 2, kind: input, shape index: {}]   ;;  %s1538_s3 = inlined_call_operand.vmem [shape: f32[1,32], index: 3, kind: input, shape index: {}]   ;;  %s1539_s4 = inlined_call_operand.vmem [shape: bf16[32,32], index: 4, kind: input, shape index: {}]   ;;  %s1540_s5 = inlined_call_operand.vmem [shape: f32[1,32], index: 5, kind: input, shape index: {}]   ;;  %s1541_s6 = inlined_call_operand.vmem [shape: bf16[32,32], index: 6, kind: input, shape index: {}]   ;;  %s1542_s7 = inlined_call_operand.vmem [shape: f32[1,32], index: 7, kind: input, shape index: {}]   ;;  %s1543_s8 = inlined_call_operand.vmem [shape: bf16[32,32], index: 8, kind: input, shape index: {}]   ;;  %s1544_s9 = inlined_call_operand.vmem [shape: f32[1,32], index: 9, kind: input, shape index: {}]   ;;  %s1545_s10 = inlined_call_operand.vmem [shape: f32[1,32], index: 10, kind: input, shape index: {}]   ;;  %s1546_s11 = inlined_call_operand.vmem [shape: f32[1,32], index: 11, kind: input, shape index: {}]   ;;  %s1547_s12 = inlined_call_operand.vmem [shape: bf16[32,32], index: 12, kind: input, shape index: {}]   ;;  %s1548_s13 = inlined_call_operand.vmem [shape: f32[32,4], index: 13, kind: input, shape index: {}]   ;;  %s1549_s14 = inlined_call_operand.vmem [shape: f32[2,8,32], index: 14, kind: output, shape index: {}]  }
   0x1 LB: > { %s1133_s30 = sadd.s32 4294967295, %s1316_s29   ;;  %p1137_p0 = scmp.ge.s32.totalorder %s1316_s29, 1  ;;  %s1316_s29 = sphi %s1396_s29, %s24_s29  }
   0x2   : > { %p420_p1 = scmp.lt.s32.totalorder %s1316_s29, 3 }
   0x4   : > { %p421_p2 = pnand %p1137_p0, %p420_p1 }
   0x5   : > { %v1294_v0 = vld [vmem:[%s1539_s4] sm:$0xff] (!%p421_p2)   ;;  %v1318_v1 = vmov (!%p421_p2), 0.0   ;;  %v1295_v2 = vld [vmem:[%s1539_s4 + $0x8] sm:$0xff] (!%p421_p2)   ;;  %vm1319_vm0 = vmmov (!%p421_p2), 0   ;;  %p468_p3 = scmp.lt.s32.totalorder (!%p421_p2), %s1133_s30, 1  ;;  %vm509_vm1 = vcmask (!%p421_p2), 261120  }
   0x6   : > { %424 = sbr.rel (%p421_p2) target bundleno = 1809 (0x711), region = 76  ;;  %1207 = vmatprep.subr.bf16.mxu1 (!%p421_p2), %v1318_v1  ;;  %1199 = vmatprep.subr.bf16.mxu0 (!%p421_p2), %v1318_v1  ;;  %v1296_v3 = vld [vmem:[%s1537_s2] sm:$0xff] (!%p421_p2)   ;;  %v1297_v4 = vld [vmem:[%s1537_s2 + $0x8] sm:$0xff] (!%p421_p2)   ;;  %v762_v39 = vld [vmem:[%s1548_s13 + $0x10] sm:$0xff] (!%p421_p2)  ;;  %v1320_v40 = vmov (!%p421_p2), 0.0|0.0   ;;  %vm838_vm2 = vcmask (!%p421_p2), 31744  }
   0x7   : > { %1208 = vmatpush3.bf16.msra.mxu1 (!%p421_p2), %v1294_v0  ;;  %1211 = vmatprep.mubr.msk.bf16.mxu1 (!%p421_p2), %vm1319_vm0, %v1318_v1  ;;  %v1145_v9 = vld [vmem:[%s1540_s5] ss:$0 sm:$0xff] (!%p421_p2)  ;;  %v1299_v22 = vld [vmem:[%s1547_s12 + $0x8] sm:$0xff] (!%p421_p2)   ;;  %v763_v42 = vld [vmem:[%s1548_s13 + $0x18] sm:$0xff] (!%p421_p2) }
   0x8   : > { %1209 = vmatprep.subr.bf16.mxu1 (!%p421_p2), %v1318_v1  ;;  %1203 = vmatprep.mubr.msk.bf16.mxu0 (!%p421_p2), %vm1319_vm0, %v1318_v1  ;;  %v1451_v13 = vld [vmem:[%s1547_s12] sm:$0xff] (!%p421_p2)   ;;  %v1301_v35 = vld [vmem:[%s1541_s6 + $0x8] sm:$0xff] (!%p421_p2)   ;;  %v1273_v43 = vpack.c.bf16 (!%p421_p2), %v763_v42, %v762_v39  ;;  %vm1277_vm3 = vmpackc.low (!%p421_p2), %vm838_vm2, %vm838_vm2 }
   0x9   : > { %1200 = vmatpush3.bf16.msra.mxu0 (!%p421_p2), %v1296_v3  ;;  %v1141_v25 = vld [vmem:[%s1538_s3] ss:$0 sm:$0xff] (!%p421_p2)  ;;  %v761_v38 = vld [vmem:[%s1548_s13 + $0x8] sm:$0xff] (!%p421_p2) }
   0xa   : > { %1201 = vmatprep.subr.bf16.mxu0 (!%p421_p2), %v1318_v1  ;;  %v1300_v29 = vld [vmem:[%s1541_s6] sm:$0xff] (!%p421_p2)  }
   0xb   : > { %1210 = vmatpush3.bf16.msra.mxu1 (!%p421_p2), %v1295_v2  ;;  %v760_v37 = vld [vmem:[%s1548_s13] sm:$0xff] (!%p421_p2)  ;;  %v1303_v2 = vld [vmem:[%s1543_s8 + $0x8] sm:$0xff] (!%p421_p2)  }
   0xc   : > { %1223 = vmatprep.subr.bf16.mxu1 (!%p421_p2), %v1318_v1  ;;  %v1270_v41 = vpack.c.bf16 (!%p421_p2), %v761_v38, %v760_v37  ;;  %v1149_v48 = vld [vmem:[%s1542_s7] ss:$0 sm:$0xff] (!%p421_p2) }
   0xd   : > { %s1551_s30 = smov (!%p468_p3, %s1133_s30), 1  ;;  %1202 = vmatpush3.bf16.msra.mxu0 %v1297_v4  ;;  %v1302_v63 = vld [vmem:[%s1543_s8] sm:$0xff]  }
   0xe   : > { %s1423_s23 = sshll.u32 %s1551_s30, 3  ;;  %1215 = vmatprep.subr.bf16.mxu0 %v1318_v1 }
   0xf   : > { %s471_s26 = scalar_lea.vmem %s1535_s0, %s1423_s23  ;;  %s475_s15 = scalar_lea.vmem %s1536_s1, %s1423_s23 }
  0x10   : > { %v1435_v5 = vld [vmem:[%s471_s26] sm:$0xff]  ;;  %s479_s21 = scalar_lea.vmem %s1549_s14, %s1423_s23 }
  0x11   : > { %v482_v6 = vld [vmem:[%s475_s15] sm:$0xff]  ;;  %v485_v36 = vpack.c.bf16 %v1435_v5, %v1435_v5 }
  0x12   : > { %v483_v7 = vadd.f32 %v482_v6, %v1435_v5 }
  0x14   : > { %v484_v8 = vpack.c.bf16 %v483_v7, %v483_v7 }
  0x16   : > { %1212 = vmatmul.mubr.msk.bf16.vlgmr.msra.gmra.mrb[0].mxu1 %vm509_vm1, %v484_v8  ;;  %1204 = vmatmul.mubr.msk.bf16.vlgmr.msra.gmra.mrb[0].mxu0 %vm509_vm1, %v484_v8 }
  0x17   : > { %1227 = vmatprep.mubr.msk.bf16.mxu1 %vm1319_vm0, %v1318_v1  ;;  %1219 = vmatprep.mubr.msk.bf16.mxu0 %vm1319_vm0, %v1318_v1 }
  0x18   : > { %1216 = vmatpush3.bf16.msra.mxu0 %v1300_v29 }
  0x19   : > { %1217 = vmatprep.subr.bf16.mxu0 %v1318_v1 }
  0x1c   : > { %1218 = vmatpush3.bf16.msra.mxu0 %v1301_v35 }
  0x1d   : > { %1269 = vmatprep.subr.bf16.mxu0 %v1320_v40 }
  0x1f   : > { %1220 = vmatmul.mubr.msk.bf16.vlgmr.msra.gmra.mrb[4].mxu0 %vm509_vm1, %v485_v36 }
  0x20   : > { %1239 = vmatprep.mubr.msk.f32.mxu0 %vm1319_vm0, %v1318_v1  ;;  %1271 = vmatpush3.bf16.msra.mxu0 %v1270_v41 }
  0x21   : > { %1272 = vmatprep.subr.bf16.mxu0 %v1320_v40 }
  0x24   : > { %1274 = vmatpush3.bf16.msra.mxu0 %v1273_v43 }
  0x25   : > { %1275 = vmatprep.subr.bf16.mxu0 %v1320_v40 }
  0xe9   : > { %v610_v10 = vpop.f32.mrb[0].mxu1  ;;  %v547_v11 = vpop.f32.mrb[0].mxu0 }
  0xea   : > { %v611_v12 = vadd.f32 %v1145_v9, %v610_v10  ;;  %v1213_v14 = vpop.f32.mrb[1].mxu1  ;;  %v1205_v15 = vpop.f32.mrb[1].mxu0  ;;  %v548_v26 = vadd.f32 %v1141_v25, %v547_v11  ;;  %v1163_v9 = vld [vmem:[%s1544_s9] ss:$0 sm:$0xff] }
  0xeb   : > { %v613_v16 = vpop.f32.mrb[2].mxu1  ;;  %v550_v17 = vpop.f32.mrb[2].mxu0 }
  0xec   : > { %v686_v18 = vpack.c.bf16 %v611_v12, %v611_v12  ;;  %v1214_v19 = vpop.f32.mrb[3].mxu1  ;;  %v1206_v20 = vpop.f32.mrb[3].mxu0  ;;  %v704_v28 = vpack.c.bf16 %v548_v26, %v548_v26  ;;  %v1168_v26 = vld [vmem:[%s1546_s11] ss:$0 sm:$0xff] }
  0xee   : > { %v699_v21 = vmul.bf16 %v1451_v13, %v686_v18  ;;  %v700_v24 = vmul.bf16 %v1299_v22, %v686_v18 }
  0xf0   : > { %v709_v23 = vsel %vm509_vm1, %v699_v21, 0  ;;  %v712_v27 = vsel %vm509_vm1, %v700_v24, 0 }
  0xf1   : > { %1224 = vmatpush3.bf16.xpose.msra.mxu1 %v709_v23 }
  0xf2   : > { %1225 = vmatprep.subr.bf16.mxu1 %v1318_v1  ;;  %v676_v49 = vpop.f32.mrb[4].mxu0 }
  0xf3   : > { %v677_v50 = vadd.f32 %v1149_v48, %v676_v49  ;;  %v1221_v51 = vpop.f32.mrb[5].mxu0 }
  0xf4   : > { %v679_v52 = vpop.f32.mrb[6].mxu0 }
  0xf5   : > { %v701_v53 = vpack.c.bf16 %v677_v50, %v677_v50  ;;  %v1222_v54 = vpop.f32.mrb[7].mxu0 }
  0xf7   : > { %v702_v55 = vmul.bf16 %v1451_v13, %v701_v53  ;;  %v703_v56 = vmul.bf16 %v1299_v22, %v701_v53 }
  0xf9   : > { %1226 = vmatpush3.bf16.xpose.msra.mxu1 %v712_v27 }
  0xfa   : > { %1253 = vmatprep.subr.bf16.mxu1 %v1318_v1 }
 0x100   : > { %1228 = vmatmul.mubr.msk.bf16.vlgmr.msra.gmra.mrb[4].mxu1 %vm509_vm1, %v704_v28 }
 0x101   : > { %1257 = vmatprep.mubr.msk.bf16.mxu1 %vm1319_vm0, %v1318_v1  ;;  %1254 = vmatpush3.bf16.msra.mxu1 %v702_v55 }
 0x102   : > { %1255 = vmatprep.subr.bf16.mxu1 %v1318_v1 }
 0x105   : > { %1256 = vmatpush3.bf16.msra.mxu1 %v703_v56 }
 0x106   : > { %1261 = vmatprep.subr.bf16.mxu1 %v1318_v1 }
 0x1d3   : > { %v748_v30 = vpop.f32.mrb[4].mxu1 }
 0x1d4   : > { %v1229_v31 = vpop.f32.mrb[5].mxu1  ;;  %v754_v32 = vsel %vm509_vm1, %v748_v30, -inf }
 0x1d5   : > { %755 = vmax.xlane.f32.xlu0 %v754_v32  ;;  %v751_v33 = vpop.f32.mrb[6].mxu1 }
 0x1d6   : > { %v1230_v34 = vpop.f32.mrb[7].mxu1 }
 0x262   : > { %v756_v44 = vpop.xlane.xlu0 %755 }
 0x263   : > { %v757_v45 = vsub.f32 %v748_v30, %v756_v44 }
 0x265   : > { %v758_v46 = vmul.f32 1.442695, %v757_v45 }
 0x267   : > { %1304 = vpow2.f32 %v758_v46 }
 0x271   : > { %v1305_v47 = vpop.eup %1304 }
 0x272   : > { %1240 = vmatmul.mubr.msk.f32.vlgmr.msra.gmra.mrb[8].mxu0 %vm509_vm1, %v1305_v47 }
 0x273   : > { %1278 = vmatpush3.bf16.xpose.msk.msra.mxu0 %vm1277_vm3, %v1270_v41  ;;  %1250 = vmatprep.mubr.msk.f32.mxu0 %vm1319_vm0, %v1318_v1 }
 0x274   : > { %1279 = vmatprep.subr.bf16.mxu0 %v1320_v40 }
 0x27b   : > { %1282 = vmatpush3.bf16.xpose.msk.msra.mxu0 %vm1277_vm3, %v1273_v43 }
 0x345   : > { %v833_v57 = vpop.f32.mrb[8].mxu0 }
 0x346   : > { %1306 = vrcp.f32 %v833_v57  ;;  %v1241_v58 = vpop.f32.mrb[9].mxu0 }
 0x350   : > { %v1307_v59 = vpop.eup %1306 }
 0x351   : > { %1251 = vmatmul.mubr.msk.f32.vlgmr.msra.gmra.mrb[10].mxu0 %vm838_vm2, %v1307_v59 }
 0x424   : > { %v920_v60 = vpop.f32.mrb[10].mxu0 }
 0x425   : > { %v924_v61 = vmul.f32 %v1305_v47, %v920_v60  ;;  %v1252_v62 = vpop.f32.mrb[11].mxu0 }
 0x427   : > { %v925_v0 = vpack.c.bf16 %v924_v61, %v924_v61 }
 0x429   : > { %1258 = vmatmul.mubr.msk.bf16.vlgmr.msra.gmra.mrb[8].mxu1 %vm509_vm1, %v925_v0 }
 0x42a   : > { %1262 = vmatpush3.bf16.msra.mxu1 %v1302_v63  ;;  %1265 = vmatprep.mubr.msk.bf16.mxu1 %vm1319_vm0, %v1318_v1 }
 0x42b   : > { %1263 = vmatprep.subr.bf16.mxu1 %v1318_v1 }
 0x42e   : > { %1264 = vmatpush3.bf16.msra.mxu1 %v1303_v2 }
 0x4fc   : > { %v963_v3 = vpop.f32.mrb[8].mxu1 }
 0x4fd   : > { %v969_v4 = vpack.c.bf16 %v963_v3, %v963_v3  ;;  %v1259_v6 = vpop.f32.mrb[9].mxu1 }
 0x4fe   : > { %v966_v7 = vpop.f32.mrb[10].mxu1 }
 0x4ff   : > { %v1260_v8 = vpop.f32.mrb[11].mxu1  ;;  %1266 = vmatmul.mubr.msk.bf16.vlgmr.msra.gmra.mrb[12].mxu1 %vm509_vm1, %v969_v4 }
 0x5d2   : > { %v1030_v10 = vpop.f32.mrb[12].mxu1 }
 0x5d3   : > { %v1031_v11 = vadd.f32 %v1163_v9, %v1030_v10  ;;  %v1267_v12 = vpop.f32.mrb[13].mxu1 }
 0x5d4   : > { %v1033_v13 = vpop.f32.mrb[14].mxu1 }
 0x5d5   : > { %v1268_v14 = vpop.f32.mrb[15].mxu1  ;;  %v1036_v15 = vadd.f32 %v1031_v11, %v1435_v5  ;;  %v1167_v5 = vld [vmem:[%s1545_s10] ss:$0 sm:$0xff] }
 0x5d7   : > { %v1037_v1 = vsel %vm509_vm1, %v1036_v15, 0.0 }
 0x5d8   : > { %1038 = vadd.xlane.f32.xlu0 %v1037_v1 }
 0x665   : > { %v1039_v16 = vpop.xlane.xlu0 %1038 }
 0x666   : > { %v1041_v17 = vmul.f32 0.03125, %v1039_v16 }
 0x668   : > { %v1042_v18 = vsub.f32 %v1036_v15, %v1041_v17 }
 0x66a   : > { %v1043_v19 = vmul.f32 %v1042_v18, %v1042_v18 }
 0x66c   : > { %v1044_v20 = vsel %vm509_vm1, %v1043_v19, 0.0 }
 0x66d   : > { %1045 = vadd.xlane.f32.xlu1 %v1044_v20 }
 0x6fa   : > { %v1046_v21 = vpop.xlane.xlu1 %1045 }
 0x6fb   : > { %v1047_v22 = vmul.f32 0.03125, %v1046_v21 }
 0x6fd   : > { %v1048_v23 = vadd.f32 1e-05, %v1047_v22 }
 0x6ff   : > { %1308 = vrsqrt.f32 %v1048_v23 }
 0x709   : > { %v1309_v24 = vpop.eup %1308 }
 0x70a   : > { %v1050_v25 = vmul.f32 %v1309_v24, %v1042_v18 }
 0x70c   : > { %v1058_v27 = vmul.f32 %v1167_v5, %v1050_v25 }
 0x70e   : > { %v1066_v28 = vadd.f32 %v1168_v26, %v1058_v27 }
 0x710   : > { %1067 = vst.msk [vmem:[%s479_s21] sm:$0xff] %vm509_vm1, %v1066_v28 }
 0x711 PF: > { %s24_s29 = sadd.s32 1, %s1316_s29  }
 0x712   : > { %p21_p4 = scmp.ge.s32.totalorder %s24_s29, 4  }
 0x714   :  { %23 = sbr.rel (!%p21_p4) target bundleno = 1 (0x1), region = 109 }

</bundles_post_ra>
